<compile_context>
chip_gen: v7x
topology: tpu7x:2x2x1
jax: 0.10.0
libtpu: 0.0.40
codegen_flags: <defaults>
</compile_context>

<pallas_src>
import functools

import jax
import jax.numpy as jnp
from jax import lax
from jax.experimental import pallas as pl
from jax.experimental.pallas import tpu as pltpu

CONFIG = {"model": {"occupancy_head": {"num_classes": 3}}}
NUM_CLASSES = CONFIG["model"]["occupancy_head"]["num_classes"]
CLASS_WEIGHTS = (1.0, 2.0, 0.5)     # from OccupancyLoss.__init__

LANES = 128
NUM_ACC = 10    # ce_num, ce_den, inter[3], sum_p[2], sum_t[3]


def _round_up(x, m):
    return (x + m - 1) // m * m


def _occupancy_loss_kernel(pred_ref, gt_ref, out_ref, *, n_valid, tile_rows,
                           acc_rows, num_tiles, needs_mask):
    i = pl.program_id(0)
    f32 = jnp.float32
    w0, w1, w2 = CLASS_WEIGHTS

    @pl.when(i == 0)
    def _():
        out_ref[...] = jnp.zeros_like(out_ref)

    def body(use_mask):
        # dense (tile_rows, 128) slabs, one per class; cast to f32 once in VMEM
        p0 = pred_ref[0].astype(f32)
        p1 = pred_ref[1].astype(f32)
        p2 = pred_ref[2].astype(f32)
        g0 = gt_ref[0].astype(f32)
        g1 = gt_ref[1].astype(f32)
        g2 = gt_ref[2].astype(f32)

        if use_mask:
            # tail tile only: clamp undefined / padded pixels BEFORE exp
            row = lax.broadcasted_iota(jnp.int32, (tile_rows, LANES), 0)
            col = lax.broadcasted_iota(jnp.int32, (tile_rows, LANES), 1)
            idx = i * (tile_rows * LANES) + row * LANES + col
            valid = idx < n_valid
            maskf = valid.astype(f32)
            zero = jnp.float32(0.0)
            p0 = jnp.where(valid, p0, zero)
            p1 = jnp.where(valid, p1, zero)
            p2 = jnp.where(valid, p2, zero)
            g0 = jnp.where(valid, g0, zero)
            g1 = jnp.where(valid, g1, zero)
            g2 = jnp.where(valid, g2, zero)

        # argmax(gt, axis=class) as a first-max one-hot (elementwise, no XLU)
        g_max = jnp.maximum(jnp.maximum(g0, g1), g2)
        is0 = g0 >= g_max
        is1 = jnp.logical_and(g1 >= g_max, jnp.logical_not(is0))
        oh0 = is0.astype(f32)
        oh1 = is1.astype(f32)
        oh2 = 1.0 - oh0 - oh1

        # softmax / log-sum-exp over the class axis (elementwise over 3 slabs)
        p_max = jnp.maximum(jnp.maximum(p0, p1), p2)
        s0 = p0 - p_max
        s1 = p1 - p_max
        s2 = p2 - p_max
        e0 = jnp.exp(s0)
        e1 = jnp.exp(s1)
        e2 = jnp.exp(s2)
        sum_exp = e0 + e1 + e2
        lse = jnp.log(sum_exp)
        inv = pl.reciprocal(sum_exp, approx=False)   # exact; one recip, reused
        if use_mask:
            inv = inv * maskf                        # fold mask into softmax once
        sm0 = e0 * inv
        sm1 = e1 * inv
        sm2 = e2 * inv

        # weighted cross-entropy pieces (log_softmax never materialized)
        nll = lse - (oh0 * s0 + oh1 * s1 + oh2 * s2)
        pixel_w = w2 + (w0 - w2) * oh0 + (w1 - w2) * oh1
        if use_mask:
            pixel_w = pixel_w * maskf

        partials = (
            pixel_w * nll,   # 0: CE numerator
            pixel_w,         # 1: CE denominator (sum of pixel weights)
            sm0 * g0,        # 2..4: per-class intersection
            sm1 * g1,
            sm2 * g2,
            sm0,             # 5..6: softmax sums for classes 0,1
            sm1,             #       (class 2 = n_valid - sum0 - sum1 in wrapper)
            g0,              # 7..9: per-class target sums
            g1,
            g2,
        )
        for q, val in enumerate(partials):
            if acc_rows != tile_rows:
                # free vreg-granular reshape + pure-VPU tree add -> (8, 128)
                val = val.reshape(tile_rows // acc_rows, acc_rows, LANES)
                val = val.sum(axis=0)
            out_ref[q] += val

    if not needs_mask:
        body(False)
    elif num_tiles == 1:
        body(True)
    else:
        last = num_tiles - 1

        @pl.when(i != last)
        def _():
            body(False)          # unmasked fast path (interior tiles)

        @pl.when(i == last)
        def _():
            body(True)           # masked ragged tail


def occupancy_loss(predictions, targets, *, tile_m=1024):
    """predictions/targets: dicts with 'occupancy' of shape (3, H, W)."""
    pred = predictions["occupancy"]
    gt = targets.get("occupancy")
    if gt is None:
        zero = jnp.float32(0.0)
        return {"total_loss": zero, "seg_loss": zero}

    C, H, W = pred.shape
    assert C == NUM_CLASSES
    n = H * W
    n_pad = _round_up(n, LANES)          # lane pad only (copy only if needed)
    m_rows = n_pad // LANES              # rows of 128 pixels

    # Block rows: full array extent if it fits in one tile (always legal),
    # otherwise an explicit multiple of 8; ragged tail handled in-kernel.
    if m_rows <= tile_m:
        tile_rows = m_rows
    else:
        tile_rows = _round_up(min(tile_m, m_rows), 8)
    num_tiles = pl.cdiv(m_rows, tile_rows)
    acc_rows = 8 if (tile_rows % 8 == 0) else tile_rows
    needs_mask = n < num_tiles * tile_rows * LANES

    def repack(x):
        x = x.reshape(C, n)
        if n_pad != n:                   # small copy only when n % 128 != 0
            x = jnp.pad(x, ((0, 0), (0, n_pad - n)))
        return x.reshape(C, m_rows, LANES)   # pure metadata reshape otherwise

    pred3 = repack(pred)     # native dtype; cast to f32 happens in-kernel
    gt3 = repack(gt)

    kernel = functools.partial(
        _occupancy_loss_kernel, n_valid=n, tile_rows=tile_rows,
        acc_rows=acc_rows, num_tiles=num_tiles, needs_mask=needs_mask)

    in_block = pl.BlockSpec((C, tile_rows, LANES), lambda i: (0, i, 0))

    partial_sums = pl.pallas_call(
        kernel,
        out_shape=jax.ShapeDtypeStruct((NUM_ACC, acc_rows, LANES), jnp.float32),
        grid=(num_tiles,),
        in_specs=[in_block, in_block],
        out_specs=pl.BlockSpec((NUM_ACC, acc_rows, LANES), lambda i: (0, 0, 0)),
        compiler_params=pltpu.CompilerParams(
            dimension_semantics=("arbitrary",)),
    )(pred3, gt3)

    sums = jnp.sum(partial_sums, axis=(1, 2))      # tiny final reduce in JAX
    ce_loss = sums[0] / sums[1]
    inter = sums[2:5]
    sum_p = jnp.stack([sums[5], sums[6],
                       jnp.float32(n) - sums[5] - sums[6]])  # softmax sums to 1
    sum_t = sums[7:10]
    union = sum_p + sum_t - inter
    iou_loss = jnp.mean(1.0 - inter / (union + 1e-6))
    total = 0.6 * ce_loss + 0.4 * iou_loss
    return {"total_loss": total, "seg_loss": total}


def _reference_loss(pred, gt):
    """Pure-JAX reference replicating the PyTorch forward, for a sanity check."""
    C = pred.shape[0]
    labels = jnp.argmax(gt, axis=0)                          # (H, W)
    log_sm = jax.nn.log_softmax(pred, axis=0)                # (C, H, W)
    onehot = jax.nn.one_hot(labels, C, axis=0)               # (C, H, W)
    w = jnp.array(CLASS_WEIGHTS, jnp.float32)
    pixel_w = w[labels]
    nll = -jnp.sum(onehot * log_sm, axis=0)
    ce = jnp.sum(pixel_w * nll) / jnp.sum(pixel_w)
    sm = jax.nn.softmax(pred, axis=0)
    iou_losses = []
    for c in range(C):
        inter = jnp.sum(sm[c] * gt[c])
        union = jnp.sum(sm[c]) + jnp.sum(gt[c]) - inter
        iou_losses.append(1.0 - inter / (union + 1e-6))
    return 0.6 * ce + 0.4 * jnp.mean(jnp.stack(iou_losses))


if __name__ == "__main__":
    key = jax.random.PRNGKey(0)

    cases = [
        ((16, 16), {}),             # n % 128 == 0, single full-extent block
        ((10, 37), {}),             # lane padding + masked tail, rows < 8
        ((64, 64), {}),             # reshape-reduce accumulator path
        ((44, 44), {"tile_m": 8}),  # multi-tile: unmasked interior + masked tail
    ]
    for (H, W), kw in cases:
        key, k1, k2 = jax.random.split(key, 3)
        pred_occ = jax.random.normal(k1, (NUM_CLASSES, H, W), jnp.float32)
        # synthetic one-hot ground-truth occupancy map
        gt_labels = jax.random.randint(k2, (H, W), 0, NUM_CLASSES)
        gt_occ = jax.nn.one_hot(gt_labels, NUM_CLASSES, axis=0).astype(jnp.float32)

        out = occupancy_loss({"occupancy": pred_occ}, {"occupancy": gt_occ}, **kw)
        total = jax.block_until_ready(out["total_loss"])
        ref = _reference_loss(pred_occ, gt_occ)
        assert jnp.allclose(total, ref, atol=1e-5, rtol=1e-5), (H, W, total, ref)

    print("KERNEL_OK")
</pallas_src>

<mosaic_0001>
module attributes {stable_mosaic.version = 11 : i64} {
  func.func @_occupancy_loss_kernel(%arg0: i32, %arg1: memref<3x2x128xf32, #tpu.memory_space<vmem>>, %arg2: memref<3x2x128xf32, #tpu.memory_space<vmem>>, %arg3: memref<10x2x128xf32, #tpu.memory_space<vmem>>) attributes {dimension_semantics = [#tpu.dimension_semantics<arbitrary>], iteration_bounds = array<i64: 1>, scalar_prefetch = 0 : i64, scratch_operands = 0 : i64, tpu.core_type = #tpu.core_type<tc>, window_params = [{transform_indices = @transform_0, window_bounds = array<i64: 3, 2, 128>}, {transform_indices = @transform_1, window_bounds = array<i64: 3, 2, 128>}, {pipeline_mode = #tpu.pipeline_mode<synchronous>, transform_indices = @transform_2, window_bounds = array<i64: 10, 2, 128>}]} {
    %c0_i32 = arith.constant 0 : i32
    %0 = arith.cmpi eq, %arg0, %c0_i32 : i32
    %1 = arith.extui %0 : i1 to i32
    %c0_i32_0 = arith.constant 0 : i32
    %2 = arith.cmpi ne, %1, %c0_i32_0 : i32
    scf.if %2 {
      %cst_73 = arith.constant 0.000000e+00 : f32
      %120 = vector.broadcast %cst_73 : f32 to vector<10x2x128xf32>
      %c0_74 = arith.constant 0 : index
      %c0_75 = arith.constant 0 : index
      %c0_76 = arith.constant 0 : index
      %121 = vector.load %arg3[%c0_74, %c0_75, %c0_76] : memref<10x2x128xf32, #tpu.memory_space<vmem>>, vector<10x2x128xf32>
      tpu.vector_store %arg3[%c0_74, %c0_75, %c0_76], %120 {strides = array<i32>} : memref<10x2x128xf32, #tpu.memory_space<vmem>>, vector<10x2x128xf32>,
    } else {
    }
    %c0 = arith.constant 0 : index
    %c0_1 = arith.constant 0 : index
    %c0_2 = arith.constant 0 : index
    %3 = vector.load %arg1[%c0, %c0_1, %c0_2] : memref<3x2x128xf32, #tpu.memory_space<vmem>>, vector<1x2x128xf32>
    %4 = vector.shape_cast %3 : vector<1x2x128xf32> to vector<2x128xf32>
    %c1 = arith.constant 1 : index
    %c0_3 = arith.constant 0 : index
    %c0_4 = arith.constant 0 : index
    %5 = vector.load %arg1[%c1, %c0_3, %c0_4] : memref<3x2x128xf32, #tpu.memory_space<vmem>>, vector<1x2x128xf32>
    %6 = vector.shape_cast %5 : vector<1x2x128xf32> to vector<2x128xf32>
    %c2 = arith.constant 2 : index
    %c0_5 = arith.constant 0 : index
    %c0_6 = arith.constant 0 : index
    %7 = vector.load %arg1[%c2, %c0_5, %c0_6] : memref<3x2x128xf32, #tpu.memory_space<vmem>>, vector<1x2x128xf32>
    %8 = vector.shape_cast %7 : vector<1x2x128xf32> to vector<2x128xf32>
    %c0_7 = arith.constant 0 : index
    %c0_8 = arith.constant 0 : index
    %c0_9 = arith.constant 0 : index
    %9 = vector.load %arg2[%c0_7, %c0_8, %c0_9] : memref<3x2x128xf32, #tpu.memory_space<vmem>>, vector<1x2x128xf32>
    %10 = vector.shape_cast %9 : vector<1x2x128xf32> to vector<2x128xf32>
    %c1_10 = arith.constant 1 : index
    %c0_11 = arith.constant 0 : index
    %c0_12 = arith.constant 0 : index
    %11 = vector.load %arg2[%c1_10, %c0_11, %c0_12] : memref<3x2x128xf32, #tpu.memory_space<vmem>>, vector<1x2x128xf32>
    %12 = vector.shape_cast %11 : vector<1x2x128xf32> to vector<2x128xf32>
    %c2_13 = arith.constant 2 : index
    %c0_14 = arith.constant 0 : index
    %c0_15 = arith.constant 0 : index
    %13 = vector.load %arg2[%c2_13, %c0_14, %c0_15] : memref<3x2x128xf32, #tpu.memory_space<vmem>>, vector<1x2x128xf32>
    %14 = vector.shape_cast %13 : vector<1x2x128xf32> to vector<2x128xf32>
    %15 = arith.maximumf %10, %12 : vector<2x128xf32>
    %16 = arith.maximumf %15, %14 : vector<2x128xf32>
    %17 = arith.cmpf oge, %10, %16 : vector<2x128xf32>
    %18 = arith.cmpf oge, %12, %16 : vector<2x128xf32>
    %cst = arith.constant dense<true> : vector<2x128xi1>
    %19 = arith.xori %17, %cst : vector<2x128xi1>
    %20 = arith.andi %18, %19 : vector<2x128xi1>
    %21 = arith.extui %17 : vector<2x128xi1> to vector<2x128xi32>
    %22 = arith.sitofp %21 : vector<2x128xi32> to vector<2x128xf32>
    %23 = arith.extui %20 : vector<2x128xi1> to vector<2x128xi32>
    %24 = arith.sitofp %23 : vector<2x128xi32> to vector<2x128xf32>
    %cst_16 = arith.constant 1.000000e+00 : f32
    %25 = vector.broadcast %cst_16 : f32 to vector<2x128xf32>
    %26 = arith.subf %25, %22 : vector<2x128xf32>
    %27 = arith.subf %26, %24 : vector<2x128xf32>
    %28 = arith.maximumf %4, %6 : vector<2x128xf32>
    %29 = arith.maximumf %28, %8 : vector<2x128xf32>
    %30 = arith.subf %4, %29 : vector<2x128xf32>
    %31 = arith.subf %6, %29 : vector<2x128xf32>
    %32 = arith.subf %8, %29 : vector<2x128xf32>
    %33 = math.exp %30 : vector<2x128xf32>
    %34 = math.exp %31 : vector<2x128xf32>
    %35 = math.exp %32 : vector<2x128xf32>
    %36 = arith.addf %33, %34 : vector<2x128xf32>
    %37 = arith.addf %36, %35 : vector<2x128xf32>
    %38 = math.log %37 : vector<2x128xf32>
    %39 = tpu.reciprocal %37 : vector<2x128xf32> -> vector<2x128xf32>
    %40 = arith.mulf %33, %39 : vector<2x128xf32>
    %41 = arith.mulf %34, %39 : vector<2x128xf32>
    %42 = arith.mulf %35, %39 : vector<2x128xf32>
    %43 = arith.mulf %22, %30 : vector<2x128xf32>
    %44 = arith.mulf %24, %31 : vector<2x128xf32>
    %45 = arith.addf %43, %44 : vector<2x128xf32>
    %46 = arith.mulf %27, %32 : vector<2x128xf32>
    %47 = arith.addf %45, %46 : vector<2x128xf32>
    %48 = arith.subf %38, %47 : vector<2x128xf32>
    %cst_17 = arith.constant 5.000000e-01 : f32
    %49 = vector.broadcast %cst_17 : f32 to vector<2x128xf32>
    %50 = arith.mulf %49, %22 : vector<2x128xf32>
    %cst_18 = arith.constant 5.000000e-01 : f32
    %51 = vector.broadcast %cst_18 : f32 to vector<2x128xf32>
    %52 = arith.addf %51, %50 : vector<2x128xf32>
    %cst_19 = arith.constant 1.500000e+00 : f32
    %53 = vector.broadcast %cst_19 : f32 to vector<2x128xf32>
    %54 = arith.mulf %53, %24 : vector<2x128xf32>
    %55 = arith.addf %52, %54 : vector<2x128xf32>
    %56 = arith.mulf %55, %48 : vector<2x128xf32>
    %57 = arith.mulf %40, %10 : vector<2x128xf32>
    %58 = arith.mulf %41, %12 : vector<2x128xf32>
    %59 = arith.mulf %42, %14 : vector<2x128xf32>
    %c0_20 = arith.constant 0 : index
    %c0_21 = arith.constant 0 : index
    %c0_22 = arith.constant 0 : index
    %60 = vector.load %arg3[%c0_20, %c0_21, %c0_22] : memref<10x2x128xf32, #tpu.memory_space<vmem>>, vector<1x2x128xf32>
    %61 = vector.shape_cast %60 : vector<1x2x128xf32> to vector<2x128xf32>
    %62 = arith.addf %61, %56 : vector<2x128xf32>
    %c0_23 = arith.constant 0 : index
    %c0_24 = arith.constant 0 : index
    %c0_25 = arith.constant 0 : index
    %63 = vector.load %arg3[%c0_23, %c0_24, %c0_25] : memref<10x2x128xf32, #tpu.memory_space<vmem>>, vector<1x2x128xf32>
    %64 = vector.shape_cast %63 : vector<1x2x128xf32> to vector<2x128xf32>
    %65 = vector.shape_cast %62 : vector<2x128xf32> to vector<1x2x128xf32>
    tpu.vector_store %arg3[%c0_23, %c0_24, %c0_25], %65 {strides = array<i32>} : memref<10x2x128xf32, #tpu.memory_space<vmem>>, vector<1x2x128xf32>,
    %c1_26 = arith.constant 1 : index
    %c0_27 = arith.constant 0 : index
    %c0_28 = arith.constant 0 : index
    %66 = vector.load %arg3[%c1_26, %c0_27, %c0_28] : memref<10x2x128xf32, #tpu.memory_space<vmem>>, vector<1x2x128xf32>
    %67 = vector.shape_cast %66 : vector<1x2x128xf32> to vector<2x128xf32>
    %68 = arith.addf %67, %55 : vector<2x128xf32>
    %c1_29 = arith.constant 1 : index
    %c0_30 = arith.constant 0 : index
    %c0_31 = arith.constant 0 : index
    %69 = vector.load %arg3[%c1_29, %c0_30, %c0_31] : memref<10x2x128xf32, #tpu.memory_space<vmem>>, vector<1x2x128xf32>
    %70 = vector.shape_cast %69 : vector<1x2x128xf32> to vector<2x128xf32>
    %71 = vector.shape_cast %68 : vector<2x128xf32> to vector<1x2x128xf32>
    tpu.vector_store %arg3[%c1_29, %c0_30, %c0_31], %71 {strides = array<i32>} : memref<10x2x128xf32, #tpu.memory_space<vmem>>, vector<1x2x128xf32>,
    %c2_32 = arith.constant 2 : index
    %c0_33 = arith.constant 0 : index
    %c0_34 = arith.constant 0 : index
    %72 = vector.load %arg3[%c2_32, %c0_33, %c0_34] : memref<10x2x128xf32, #tpu.memory_space<vmem>>, vector<1x2x128xf32>
    %73 = vector.shape_cast %72 : vector<1x2x128xf32> to vector<2x128xf32>
    %74 = arith.addf %73, %57 : vector<2x128xf32>
    %c2_35 = arith.constant 2 : index
    %c0_36 = arith.constant 0 : index
    %c0_37 = arith.constant 0 : index
    %75 = vector.load %arg3[%c2_35, %c0_36, %c0_37] : memref<10x2x128xf32, #tpu.memory_space<vmem>>, vector<1x2x128xf32>
    %76 = vector.shape_cast %75 : vector<1x2x128xf32> to vector<2x128xf32>
    %77 = vector.shape_cast %74 : vector<2x128xf32> to vector<1x2x128xf32>
    tpu.vector_store %arg3[%c2_35, %c0_36, %c0_37], %77 {strides = array<i32>} : memref<10x2x128xf32, #tpu.memory_space<vmem>>, vector<1x2x128xf32>,
    %c3 = arith.constant 3 : index
    %c0_38 = arith.constant 0 : index
    %c0_39 = arith.constant 0 : index
    %78 = vector.load %arg3[%c3, %c0_38, %c0_39] : memref<10x2x128xf32, #tpu.memory_space<vmem>>, vector<1x2x128xf32>
    %79 = vector.shape_cast %78 : vector<1x2x128xf32> to vector<2x128xf32>
    %80 = arith.addf %79, %58 : vector<2x128xf32>
    %c3_40 = arith.constant 3 : index
    %c0_41 = arith.constant 0 : index
    %c0_42 = arith.constant 0 : index
    %81 = vector.load %arg3[%c3_40, %c0_41, %c0_42] : memref<10x2x128xf32, #tpu.memory_space<vmem>>, vector<1x2x128xf32>
    %82 = vector.shape_cast %81 : vector<1x2x128xf32> to vector<2x128xf32>
    %83 = vector.shape_cast %80 : vector<2x128xf32> to vector<1x2x128xf32>
    tpu.vector_store %arg3[%c3_40, %c0_41, %c0_42], %83 {strides = array<i32>} : memref<10x2x128xf32, #tpu.memory_space<vmem>>, vector<1x2x128xf32>,
    %c4 = arith.constant 4 : index
    %c0_43 = arith.constant 0 : index
    %c0_44 = arith.constant 0 : index
    %84 = vector.load %arg3[%c4, %c0_43, %c0_44] : memref<10x2x128xf32, #tpu.memory_space<vmem>>, vector<1x2x128xf32>
    %85 = vector.shape_cast %84 : vector<1x2x128xf32> to vector<2x128xf32>
    %86 = arith.addf %85, %59 : vector<2x128xf32>
    %c4_45 = arith.constant 4 : index
    %c0_46 = arith.constant 0 : index
    %c0_47 = arith.constant 0 : index
    %87 = vector.load %arg3[%c4_45, %c0_46, %c0_47] : memref<10x2x128xf32, #tpu.memory_space<vmem>>, vector<1x2x128xf32>
    %88 = vector.shape_cast %87 : vector<1x2x128xf32> to vector<2x128xf32>
    %89 = vector.shape_cast %86 : vector<2x128xf32> to vector<1x2x128xf32>
    tpu.vector_store %arg3[%c4_45, %c0_46, %c0_47], %89 {strides = array<i32>} : memref<10x2x128xf32, #tpu.memory_space<vmem>>, vector<1x2x128xf32>,
    %c5 = arith.constant 5 : index
    %c0_48 = arith.constant 0 : index
    %c0_49 = arith.constant 0 : index
    %90 = vector.load %arg3[%c5, %c0_48, %c0_49] : memref<10x2x128xf32, #tpu.memory_space<vmem>>, vector<1x2x128xf32>
    %91 = vector.shape_cast %90 : vector<1x2x128xf32> to vector<2x128xf32>
    %92 = arith.addf %91, %40 : vector<2x128xf32>
    %c5_50 = arith.constant 5 : index
    %c0_51 = arith.constant 0 : index
    %c0_52 = arith.constant 0 : index
    %93 = vector.load %arg3[%c5_50, %c0_51, %c0_52] : memref<10x2x128xf32, #tpu.memory_space<vmem>>, vector<1x2x128xf32>
    %94 = vector.shape_cast %93 : vector<1x2x128xf32> to vector<2x128xf32>
    %95 = vector.shape_cast %92 : vector<2x128xf32> to vector<1x2x128xf32>
    tpu.vector_store %arg3[%c5_50, %c0_51, %c0_52], %95 {strides = array<i32>} : memref<10x2x128xf32, #tpu.memory_space<vmem>>, vector<1x2x128xf32>,
    %c6 = arith.constant 6 : index
    %c0_53 = arith.constant 0 : index
    %c0_54 = arith.constant 0 : index
    %96 = vector.load %arg3[%c6, %c0_53, %c0_54] : memref<10x2x128xf32, #tpu.memory_space<vmem>>, vector<1x2x128xf32>
    %97 = vector.shape_cast %96 : vector<1x2x128xf32> to vector<2x128xf32>
    %98 = arith.addf %97, %41 : vector<2x128xf32>
    %c6_55 = arith.constant 6 : index
    %c0_56 = arith.constant 0 : index
    %c0_57 = arith.constant 0 : index
    %99 = vector.load %arg3[%c6_55, %c0_56, %c0_57] : memref<10x2x128xf32, #tpu.memory_space<vmem>>, vector<1x2x128xf32>
    %100 = vector.shape_cast %99 : vector<1x2x128xf32> to vector<2x128xf32>
    %101 = vector.shape_cast %98 : vector<2x128xf32> to vector<1x2x128xf32>
    tpu.vector_store %arg3[%c6_55, %c0_56, %c0_57], %101 {strides = array<i32>} : memref<10x2x128xf32, #tpu.memory_space<vmem>>, vector<1x2x128xf32>,
    %c7 = arith.constant 7 : index
    %c0_58 = arith.constant 0 : index
    %c0_59 = arith.constant 0 : index
    %102 = vector.load %arg3[%c7, %c0_58, %c0_59] : memref<10x2x128xf32, #tpu.memory_space<vmem>>, vector<1x2x128xf32>
    %103 = vector.shape_cast %102 : vector<1x2x128xf32> to vector<2x128xf32>
    %104 = arith.addf %103, %10 : vector<2x128xf32>
    %c7_60 = arith.constant 7 : index
    %c0_61 = arith.constant 0 : index
    %c0_62 = arith.constant 0 : index
    %105 = vector.load %arg3[%c7_60, %c0_61, %c0_62] : memref<10x2x128xf32, #tpu.memory_space<vmem>>, vector<1x2x128xf32>
    %106 = vector.shape_cast %105 : vector<1x2x128xf32> to vector<2x128xf32>
    %107 = vector.shape_cast %104 : vector<2x128xf32> to vector<1x2x128xf32>
    tpu.vector_store %arg3[%c7_60, %c0_61, %c0_62], %107 {strides = array<i32>} : memref<10x2x128xf32, #tpu.memory_space<vmem>>, vector<1x2x128xf32>,
    %c8 = arith.constant 8 : index
    %c0_63 = arith.constant 0 : index
    %c0_64 = arith.constant 0 : index
    %108 = vector.load %arg3[%c8, %c0_63, %c0_64] : memref<10x2x128xf32, #tpu.memory_space<vmem>>, vector<1x2x128xf32>
    %109 = vector.shape_cast %108 : vector<1x2x128xf32> to vector<2x128xf32>
    %110 = arith.addf %109, %12 : vector<2x128xf32>
    %c8_65 = arith.constant 8 : index
    %c0_66 = arith.constant 0 : index
    %c0_67 = arith.constant 0 : index
    %111 = vector.load %arg3[%c8_65, %c0_66, %c0_67] : memref<10x2x128xf32, #tpu.memory_space<vmem>>, vector<1x2x128xf32>
    %112 = vector.shape_cast %111 : vector<1x2x128xf32> to vector<2x128xf32>
    %113 = vector.shape_cast %110 : vector<2x128xf32> to vector<1x2x128xf32>
    tpu.vector_store %arg3[%c8_65, %c0_66, %c0_67], %113 {strides = array<i32>} : memref<10x2x128xf32, #tpu.memory_space<vmem>>, vector<1x2x128xf32>,
    %c9 = arith.constant 9 : index
    %c0_68 = arith.constant 0 : index
    %c0_69 = arith.constant 0 : index
    %114 = vector.load %arg3[%c9, %c0_68, %c0_69] : memref<10x2x128xf32, #tpu.memory_space<vmem>>, vector<1x2x128xf32>
    %115 = vector.shape_cast %114 : vector<1x2x128xf32> to vector<2x128xf32>
    %116 = arith.addf %115, %14 : vector<2x128xf32>
    %c9_70 = arith.constant 9 : index
    %c0_71 = arith.constant 0 : index
    %c0_72 = arith.constant 0 : index
    %117 = vector.load %arg3[%c9_70, %c0_71, %c0_72] : memref<10x2x128xf32, #tpu.memory_space<vmem>>, vector<1x2x128xf32>
    %118 = vector.shape_cast %117 : vector<1x2x128xf32> to vector<2x128xf32>
    %119 = vector.shape_cast %116 : vector<2x128xf32> to vector<1x2x128xf32>
    tpu.vector_store %arg3[%c9_70, %c0_71, %c0_72], %119 {strides = array<i32>} : memref<10x2x128xf32, #tpu.memory_space<vmem>>, vector<1x2x128xf32>,
    return
  }
  func.func @transform_0(%arg0: i32) -> (i32, i32, i32) {
    %c0_i32 = arith.constant 0 : i32
    %c0_i32_0 = arith.constant 0 : i32
    %c0_i32_1 = arith.constant 0 : i32
    return %c0_i32, %arg0, %c0_i32_0 : i32, i32, i32
  }
  func.func @transform_1(%arg0: i32) -> (i32, i32, i32) {
    %c0_i32 = arith.constant 0 : i32
    %c0_i32_0 = arith.constant 0 : i32
    %c0_i32_1 = arith.constant 0 : i32
    return %c0_i32, %arg0, %c0_i32_0 : i32, i32, i32
  }
  func.func @transform_2(%arg0: i32) -> (i32, i32, i32) {
    %c0_i32 = arith.constant 0 : i32
    %c0_i32_0 = arith.constant 0 : i32
    %c0_i32_1 = arith.constant 0 : i32
    %c0_i32_2 = arith.constant 0 : i32
    return %c0_i32, %c0_i32_0, %c0_i32_1 : i32, i32, i32
  }
}

</mosaic_0001>

<bundles_post_ra>
// kernel: tpu_custom_call.1
= control target key start
LH: loop header
LB: loop body
LE: loop exit
PB: predicated region body
PF: predicated region fallthrough
CT: control target
= control target key end

     0   :  { %7 = vsyncpa [#allocation3], 0  ;;  %s341_s0 = inlined_call_operand.hbm [shape: f32[3,2,128], index: 0, kind: input, shape index: {}]   ;;  %s342_s1 = inlined_call_operand.hbm [shape: f32[3,2,128], index: 1, kind: input, shape index: {}]   ;;  %s343_s2 = inlined_call_operand.hbm [shape: f32[10,2,128], index: 2, kind: output, shape index: {}]  }
   0x1   :  { %8 = vsyncpa [#allocation6], 0 }
   0x2   :  { %9 = vsyncpa [#allocation4], 0  ;;  %s257_s9 = smov [#allocation2]   ;;  %s185_s13 = scalar_lea.hbm %s341_s0, 96 }
   0x3   :  { %s15_s10 = sshll.u32 %s257_s9, 4  ;;  %p186_p0 = scmp.ne.s32.totalorder %s341_s0, %s185_s13  ;;  %s16_s10 = int_to_ptr.vmem [resolvable:$true] %s15_s10 }
   0x4   :  { %p189_p1 = scmp.lt.u32.totalorder %s185_s13, %s341_s0 }
   0x6   :  { %p191_p2 = pnand %p189_p1, %p186_p0 }
   0x8   :  { %194 = shalt.err (!%p191_p2)
}
   0x9   :  { %s195_s18 = scalar_lea.vmem %s16_s10, 96  ;;  %p200_p4 = scmp.lt.s32.totalorder %s16_s10, %s16_s10 }
   0xa   :  { %p196_p3 = scmp.ne.s32.totalorder %s16_s10, %s195_s18  ;;  %p201_p5 = scmp.lt.s32.totalorder %s195_s18, %s195_s18 }
   0xc   :  { %p202_p6 = por %p201_p5, %p200_p4 }
   0xe   :  { %p203_p7 = pnand %p202_p6, %p196_p3 }
  0x10   :  { %206 = shalt.err (!%p203_p7)
}
  0x11   :  { %s258_s19 = smov 32   ;;  %s259_s20 = smov 2  }
  0x12   :  { %21 = dma.hbm_to_vmem [thread:$0]  %s341_s0, 96, %s16_s10, [#allocation3], %s258_s19, %s258_s19, %s259_s20  }
  0x13   :  { %s260_s23 = smov [#allocation5]   ;;  %s207_s27 = scalar_lea.hbm %s342_s1, 96 }
  0x14   :  { %s27_s24 = sshll.u32 %s260_s23, 4  ;;  %p208_p8 = scmp.ne.s32.totalorder %s342_s1, %s207_s27  ;;  %s28_s24 = int_to_ptr.vmem [resolvable:$true] %s27_s24 }
  0x15   :  { %p211_p9 = scmp.lt.u32.totalorder %s207_s27, %s342_s1 }
  0x17   :  { %p213_p10 = pnand %p211_p9, %p208_p8 }
  0x19   :  { %216 = shalt.err (!%p213_p10)
}
  0x1a   :  { %s217_s4 = scalar_lea.vmem %s28_s24, 96  ;;  %p222_p12 = scmp.lt.s32.totalorder %s28_s24, %s28_s24 }
  0x1b   :  { %p218_p11 = scmp.ne.s32.totalorder %s28_s24, %s217_s4  ;;  %p223_p13 = scmp.lt.s32.totalorder %s217_s4, %s217_s4 }
  0x1d   :  { %p224_p0 = por %p223_p13, %p222_p12 }
  0x1f   :  { %p225_p1 = pnand %p224_p0, %p218_p11 }
  0x21   :  { %228 = shalt.err (!%p225_p1)
}
  0x22   :  { %33 = dma.hbm_to_vmem [thread:$0]  %s342_s1, 96, %s28_s24, [#allocation6], %s258_s19, %s258_s19, %s259_s20  }
  0x23   :  { %251 = dma.done.wait [#allocation3], 96  }
  0x24   :  { %252 = vsyncadd [#allocation3], 4294967200 }
  0x25   :  { %253 = dma.done.wait [#allocation6], 96  }
  0x26   :  { %254 = vsyncadd [#allocation6], 4294967200  ;;  %v261_v0 = vmov 0.0   ;;  %v54_v1 = vld [vmem:[#allocation2] sm:$0x3]  ;;  %vm262_vm2 = vmmov 1  }
  0x27   :  { %44 = vst [vmem:[#allocation7] sm:$0x3] %v261_v0  ;;  %45 = vst [vmem:[#allocation7 + $0x2] sm:$0x3] %v261_v0  ;;  %v56_v2 = vld [vmem:[#allocation2 + $0x2] sm:$0x3] }
  0x28   :  { %46 = vst [vmem:[#allocation7 + $0x4] sm:$0x3] %v261_v0  ;;  %47 = vst [vmem:[#allocation7 + $0x6] sm:$0x3] %v261_v0  ;;  %v58_v3 = vld [vmem:[#allocation2 + $0x4] sm:$0x3]  ;;  %v76_v7 = vmax.f32 %v54_v1, %v56_v2 }
  0x29   :  { %48 = vst [vmem:[#allocation7 + $0x8] sm:$0x3] %v261_v0  ;;  %49 = vst [vmem:[#allocation7 + $0xa] sm:$0x3] %v261_v0  ;;  %v309_v4 = vld [vmem:[#allocation5] sm:$0x3] }
  0x2a   :  { %50 = vst [vmem:[#allocation7 + $0xc] sm:$0x3] %v261_v0  ;;  %51 = vst [vmem:[#allocation7 + $0xe] sm:$0x3] %v261_v0  ;;  %v311_v5 = vld [vmem:[#allocation5 + $0x2] sm:$0x3]  ;;  %v77_v9 = vmax.f32 %v76_v7, %v58_v3 }
  0x2b   :  { %52 = vst [vmem:[#allocation7 + $0x10] sm:$0x3] %v261_v0  ;;  %53 = vst [vmem:[#allocation7 + $0x12] sm:$0x3] %v261_v0  ;;  %v313_v6 = vld [vmem:[#allocation5 + $0x4] sm:$0x3]  ;;  %v64_v8 = vmax.f32 %v309_v4, %v311_v5 }
  0x2c   :  { %v78_v13 = vsub.f32 %v54_v1, %v77_v9  ;;  %v79_v14 = vsub.f32 %v56_v2, %v77_v9  ;;  %v80_v15 = vsub.f32 %v58_v3, %v77_v9  ;;  %s263_s1 = smov [#allocation7]  }
  0x2d   :  { %v65_v10 = vmax.f32 %v64_v8, %v313_v6  ;;  %s153_s6 = sshll.u32 %s263_s1, 4  ;;  %s154_s6 = int_to_ptr.vmem [resolvable:$true] %s153_s6 }
  0x2e   :  { %v81_v21 = vmul.f32 1.442695, %v78_v13  ;;  %v83_v22 = vmul.f32 1.442695, %v79_v14  ;;  %v85_v23 = vmul.f32 1.442695, %v80_v15  ;;  %p234_p3 = scmp.lt.s32.totalorder %s154_s6, %s154_s6 }
  0x2f   :  { %vm66_vm0 = vcmp.ge.f32.partialorder %v309_v4, %v65_v10  ;;  %vm67_vm1 = vcmp.ge.f32.partialorder %v311_v5, %v65_v10  ;;  %v113_v28 = vld [vmem:[#allocation7 + $0x2] sm:$0x3]  ;;  %v117_v52 = vld [vmem:[#allocation7 + $0x4] sm:$0x3]  ;;  %v121_v53 = vld [vmem:[#allocation7 + $0x6] sm:$0x3] }
  0x30   :  { %vm68_vm3 = vmxor %vm66_vm0, %vm262_vm2  ;;  %v166_v20 = vsel %vm66_vm0, 1.0, %v261_v0  ;;  %175 = vpow2.f32 %v81_v21  ;;  %v129_v46 = vld [vmem:[#allocation7 + $0xa] sm:$0x3]  ;;  %v125_v54 = vld [vmem:[#allocation7 + $0x8] sm:$0x3]  ;;  %s229_s7 = scalar_lea.vmem %s154_s6, 320 }
  0x31   :  { %v137_v11 = vld [vmem:[#allocation7 + $0xe] sm:$0x3]  ;;  %vm69_vm4 = vmand %vm67_vm1, %vm68_vm3  ;;  %v101_v24 = vmul.f32 0.5, %v166_v20  ;;  %177 = vpow2.f32 %v83_v22  ;;  %v74_v35 = vsub.f32 1.0, %v166_v20  ;;  %v95_v38 = vmul.f32 %v166_v20, %v78_v13  ;;  %v133_v50 = vld [vmem:[#allocation7 + $0xc] sm:$0x3]  ;;  %p230_p2 = scmp.ne.s32.totalorder %s154_s6, %s229_s7  ;;  %p235_p4 = scmp.lt.s32.totalorder %s229_s7, %s229_s7 }
  0x32   :  { %v141_v12 = vld [vmem:[#allocation7 + $0x10] sm:$0x3]  ;;  %v138_v16 = vadd.f32 %v137_v11, %v309_v4  ;;  %v145_v17 = vld [vmem:[#allocation7 + $0x12] sm:$0x3]  ;;  %v167_v25 = vsel %vm69_vm4, 1.0, %v261_v0  ;;  %179 = vpow2.f32 %v85_v23 }
  0x33   :  { %v142_v18 = vadd.f32 %v141_v12, %v311_v5  ;;  %v146_v19 = vadd.f32 %v145_v17, %v313_v6  ;;  %v102_v26 = vadd.f32 0.5, %v101_v24  ;;  %v103_v27 = vmul.f32 1.5, %v167_v25  ;;  %v109_v55 = vld [vmem:[#allocation7] sm:$0x3]  ;;  %p236_p5 = por %p235_p4, %p234_p3 }
  0x34   :  { %139 = vst [vmem:[#allocation7 + $0xe] sm:$0x3] %v138_v16  ;;  %v75_v37 = vsub.f32 %v74_v35, %v167_v25  ;;  %v96_v39 = vmul.f32 %v167_v25, %v79_v14 }
  0x35   :  { %143 = vst [vmem:[#allocation7 + $0x10] sm:$0x3] %v142_v18  ;;  %147 = vst [vmem:[#allocation7 + $0x12] sm:$0x3] %v146_v19  ;;  %v104_v29 = vadd.f32 %v103_v27, %v102_v26  ;;  %p237_p6 = pnand %p236_p5, %p230_p2 }
  0x36   :  { %v97_v40 = vadd.f32 %v96_v39, %v95_v38  ;;  %v98_v41 = vmul.f32 %v80_v15, %v75_v37 }
  0x37   :  { %v114_v30 = vadd.f32 %v113_v28, %v104_v29 }
  0x38   :  { %v99_v42 = vadd.f32 %v98_v41, %v97_v40 }
  0x39   :  { %115 = vst [vmem:[#allocation7 + $0x2] sm:$0x3] %v114_v30 }
  0x3a   :  { %v176_v31 = vpop.eup %175 }
  0x3b   :  { %v178_v32 = vpop.eup %177 }
  0x3c   :  { %v180_v33 = vpop.eup %179  ;;  %v87_v34 = vadd.f32 %v178_v32, %v176_v31 }
  0x3e   :  { %v88_v36 = vadd.f32 %v180_v33, %v87_v34 }
  0x40   :  { %181 = vlog2.f32 %v88_v36 }
  0x41   :  { %183 = vrcp.f32 %v88_v36 }
  0x4a   :  { %v182_v43 = vpop.eup %181 }
  0x4b   :  { %v184_v44 = vpop.eup %183  ;;  %v90_v45 = vmul.f32 0.6931472, %v182_v43 }
  0x4c   :  { %v92_v47 = vmul.f32 %v184_v44, %v176_v31  ;;  %v93_v48 = vmul.f32 %v184_v44, %v178_v32  ;;  %v94_v49 = vmul.f32 %v184_v44, %v180_v33 }
  0x4d   :  { %v100_v51 = vsub.f32 %v90_v45, %v99_v42 }
  0x4e   :  { %v106_v56 = vmul.f32 %v92_v47, %v309_v4  ;;  %v107_v57 = vmul.f32 %v93_v48, %v311_v5  ;;  %v108_v58 = vmul.f32 %v94_v49, %v313_v6  ;;  %v130_v59 = vadd.f32 %v129_v46, %v92_v47 }
  0x4f   :  { %v105_v60 = vmul.f32 %v104_v29, %v100_v51  ;;  %v134_v61 = vadd.f32 %v133_v50, %v93_v48 }
  0x50   :  { %v118_v62 = vadd.f32 %v117_v52, %v106_v56  ;;  %v122_v63 = vadd.f32 %v121_v53, %v107_v57  ;;  %v126_v0 = vadd.f32 %v125_v54, %v108_v58  ;;  %131 = vst [vmem:[#allocation7 + $0xa] sm:$0x3] %v130_v59 }
  0x51   :  { %v110_v1 = vadd.f32 %v109_v55, %v105_v60  ;;  %135 = vst [vmem:[#allocation7 + $0xc] sm:$0x3] %v134_v61 }
  0x52   :  { %119 = vst [vmem:[#allocation7 + $0x4] sm:$0x3] %v118_v62  ;;  %123 = vst [vmem:[#allocation7 + $0x6] sm:$0x3] %v122_v63 }
  0x53   :  { %127 = vst [vmem:[#allocation7 + $0x8] sm:$0x3] %v126_v0  ;;  %111 = vst [vmem:[#allocation7] sm:$0x3] %v110_v1 }
  0x54   :  { %240 = shalt.err (!%p237_p6)
}
  0x55   :  { %s241_s10 = scalar_lea.hbm %s343_s2, 320 }
  0x56   :  { %p242_p7 = scmp.ne.s32.totalorder %s343_s2, %s241_s10  ;;  %p245_p8 = scmp.lt.u32.totalorder %s241_s10, %s343_s2 }
  0x58   :  { %p247_p9 = pnand %p245_p8, %p242_p7 }
  0x5a   :  { %250 = shalt.err (!%p247_p9)
}
  0x5b   :  { %159 = dma.vmem_to_hbm [thread:$0]  %s154_s6, 320, %s343_s2, [#allocation4], %s258_s19, %s258_s19, %s259_s20  }
  0x5c   :  { %255 = dma.done.wait [#allocation4], 320  }
  0x5d   :  { %256 = vsyncadd [#allocation4], 4294966976 }
  0x5e   :  { %163 = vsyncpa [#allocation3], 1 }
  0x5f   :  { %164 = vsyncpa [#allocation6], 1 }
  0x60   :  { %165 = vsyncpa [#allocation4], 1 }

</bundles_post_ra>
